<compile_context>
chip_gen: v6e
topology: v6e:2x2x1
jax: 0.10.0
libtpu: 0.0.40
codegen_flags: <defaults>
</compile_context>

<pallas_src>
import functools

import numpy as np
import jax
import jax.numpy as jnp
from jax import lax
from jax.experimental import pallas as pl
from jax.experimental.pallas import tpu as pltpu


# ----------------------------- Pallas kernel --------------------------------
def _mha_self_attn_kernel(x_ref, wqkv_ref, wo_ref, o_ref, w_ref, o_acc_ref, *,
                          num_heads, head_dim_qk, head_dim_vo,
                          qk_embed, vo_embed, scale):
    # x_ref     : (B, T, Dm)         f32  self-attention input (query=key=value)
    # wqkv_ref  : (2E+Evo, Dm)       f32  torch-layout [Wq; Wk; Wv] stacked rows
    # wo_ref    : (Do, Evo)          f32  torch-layout output projection
    # o_ref     : (B, T, Do)         f32  attention output (lane-dense, Do=128)
    # w_ref     : (B, T, H*T)        f32  attention weights, head-major lane slab
    # o_acc_ref : (B, T, Evo)        f32  VMEM scratch for per-head PV results
    B, T, Dm = x_ref.shape
    Do = wo_ref.shape[0]

    # ---- fused Q/K/V projection: one (B*T, Dm) @ (Dm, 2E+Evo) MXU pass ------
    # nn.Linear stores W as (out, in); y = x @ W.T, i.e. contract the last dim
    # of both operands (trans_b) -- no transpose materialized anywhere.
    x2 = x_ref[...].reshape(B * T, Dm).astype(jnp.bfloat16)
    w_qkv = wqkv_ref[...].astype(jnp.bfloat16)
    qkv = lax.dot_general(x2, w_qkv,
                          dimension_numbers=(((1,), (1,)), ((), ())),
                          preferred_element_type=jnp.float32)
    qkv = qkv.reshape(B, T, 2 * qk_embed + vo_embed).astype(jnp.bfloat16)

    k_off = qk_embed
    v_off = 2 * qk_embed
    probs = []
    for h in range(num_heads):            # static unroll: no per-head grid cost
        q_h = qkv[:, :, h * head_dim_qk:(h + 1) * head_dim_qk]
        k_h = qkv[:, :, k_off + h * head_dim_qk:k_off + (h + 1) * head_dim_qk]
        v_h = qkv[:, :, v_off + h * head_dim_vo:v_off + (h + 1) * head_dim_vo]

        # scores (B, Tq, Tk), scaled by head_dim_qk**-0.5 as in the module.
        s = jnp.einsum('btd,bsd->bts', q_h, k_h,
                       preferred_element_type=jnp.float32) * scale

        # Exact f32 softmax over keys: the *returned* weights row-sum to 1,
        # matching torch's nn.Softmax (no approximate reciprocal here).
        m = jnp.max(s, axis=-1, keepdims=True)
        e = jnp.exp(s - m)
        p = e / jnp.sum(e, axis=-1, keepdims=True)
        probs.append(p)

        # P @ V on the MXU (bf16 operands, f32 accumulation), written straight
        # into the lane-dense output scratch at lane offset h*head_dim_vo.
        pv = jnp.einsum('bts,bsd->btd', p.astype(jnp.bfloat16), v_h,
                        preferred_element_type=jnp.float32)
        o_acc_ref[:, :, h * head_dim_vo:(h + 1) * head_dim_vo] = pv

    # One slab store of all heads' probabilities: (B, Tq, H*Tk) instead of four
    # separate 8-lane masked stores.
    w_ref[...] = jnp.concatenate(probs, axis=-1)

    # ---- output projection: (B*T, Evo) @ (Evo, Do), full-lane store ---------
    o2 = o_acc_ref[...].reshape(B * T, vo_embed).astype(jnp.bfloat16)
    w_o = wo_ref[...].astype(jnp.bfloat16)
    o = lax.dot_general(o2, w_o,
                        dimension_numbers=(((1,), (1,)), ((), ())),
                        preferred_element_type=jnp.float32)
    o_ref[...] = o.reshape(B, T, Do)


# ------------------------------ wrapper --------------------------------------
def mha_forward(query, key, value, w_qkv, w_o, *, num_heads):
    """Forward of MultiHeadAttention (softmax attention, no bias/mask/rel-pos).

    w_qkv : torch-layout (out, in) q/k/v projection weights stacked along the
            out axis, i.e. jnp.concatenate([Wq, Wk, Wv], axis=0).  Build it
            ONCE at module init so there is no per-call weight transform.
    w_o   : torch-layout (o_dim, vo_embed) output projection weight.

    Returns (o, weights) like the torch module:
      o (B, Tq, o_dim), weights (B, H, Tq, Tk).
    """
    # TODO(synk): only the self-attention call pattern (query is key is value)
    # is fused here; cross-attention would need separate K/V projection matmuls.
    if (key is not query) or (value is not query):
        raise NotImplementedError(
            "fused Pallas kernel implements the self-attention path only")

    B, T, Dm = query.shape
    Do, vo_embed = w_o.shape
    qk_embed = (w_qkv.shape[0] - vo_embed) // 2
    assert qk_embed % num_heads == 0 and vo_embed % num_heads == 0
    head_dim_qk = qk_embed // num_heads
    head_dim_vo = vo_embed // num_heads
    scale = float(head_dim_qk) ** -0.5

    flops = (2 * B * T * Dm * (2 * qk_embed + vo_embed)          # fused QKV proj
             + 2 * B * num_heads * T * T * head_dim_qk           # q @ k^T
             + 2 * B * num_heads * T * T * head_dim_vo           # p @ v
             + 2 * B * T * vo_embed * Do)                        # output proj
    bytes_accessed = 4 * (B * T * Dm + w_qkv.size + w_o.size
                          + B * T * Do + B * T * num_heads * T)

    kernel = functools.partial(
        _mha_self_attn_kernel, num_heads=num_heads,
        head_dim_qk=head_dim_qk, head_dim_vo=head_dim_vo,
        qk_embed=qk_embed, vo_embed=vo_embed, scale=scale)

    o, w_slab = pl.pallas_call(
        kernel,
        out_shape=(jax.ShapeDtypeStruct((B, T, Do), jnp.float32),
                   jax.ShapeDtypeStruct((B, T, num_heads * T), jnp.float32)),
        grid=(1,),                       # single fused step: overhead-bound here
        in_specs=[
            pl.BlockSpec((B, T, Dm), lambda i: (0, 0, 0)),
            pl.BlockSpec(w_qkv.shape, lambda i: (0, 0)),
            pl.BlockSpec(w_o.shape, lambda i: (0, 0)),
        ],
        out_specs=(pl.BlockSpec((B, T, Do), lambda i: (0, 0, 0)),
                   pl.BlockSpec((B, T, num_heads * T), lambda i: (0, 0, 0))),
        scratch_shapes=[pltpu.VMEM((B, T, vo_embed), jnp.float32)],
        compiler_params=pltpu.CompilerParams(
            dimension_semantics=("arbitrary",)),
        cost_estimate=pl.CostEstimate(
            flops=flops,
            transcendentals=B * num_heads * T * T,
            bytes_accessed=bytes_accessed),
    )(query, w_qkv, w_o)

    # Head-major lane slab -> (B, H, Tq, Tk); ~2 KiB reshape/transpose in the
    # wrapper (was already present before).
    weights = jnp.transpose(w_slab.reshape(B, T, num_heads, T), (0, 2, 1, 3))
    return o, weights


# ------------------------------ pure-JAX reference ----------------------------
def mha_ref(query, key, value, wq, wk, wv, wo, num_heads):
    q = query @ wq.T
    k = key @ wk.T
    v = value @ wv.T
    B, Tq, E = q.shape
    Tk = k.shape[1]
    dqk = E // num_heads
    dvo = v.shape[-1] // num_heads
    qh = q.reshape(B, Tq, num_heads, dqk)
    kh = k.reshape(B, Tk, num_heads, dqk)
    vh = v.reshape(B, Tk, num_heads, dvo)
    logits = jnp.einsum('bnhk,bmhk->bhnm', qh, kh) * dqk ** (-0.5)
    w = jax.nn.softmax(logits, axis=-1)
    o = jnp.einsum('bhnm,bmhk->bnhk', w, vh).reshape(B, Tq, num_heads * dvo)
    return o @ wo.T, w


if __name__ == "__main__":
    # Small shapes consistent with the module: self-attention with batch=2,
    # seq=8, model dim=128, 4 heads of size 32 (lane-dense H*dh = 128).
    B, T, Dm, H = 2, 8, 128, 4

    key0 = jax.random.PRNGKey(0)
    kx, k1, k2, k3, k4 = jax.random.split(key0, 5)
    X = jax.random.normal(kx, (B, T, Dm), dtype=jnp.float32)
    # initialization_method='normal' of the torch module: N(0, 0.02), no bias.
    Wq = 0.02 * jax.random.normal(k1, (Dm, Dm), dtype=jnp.float32)
    Wk = 0.02 * jax.random.normal(k2, (Dm, Dm), dtype=jnp.float32)
    Wv = 0.02 * jax.random.normal(k3, (Dm, Dm), dtype=jnp.float32)
    Wo = 0.02 * jax.random.normal(k4, (Dm, Dm), dtype=jnp.float32)

    # Init-time (once-per-module) weight stacking -- NOT a per-call wrapper op.
    Wqkv = jnp.concatenate([Wq, Wk, Wv], axis=0)     # (3*128, 128), torch layout

    o, w = mha_forward(X, X, X, Wqkv, Wo, num_heads=H)
    o = jax.block_until_ready(o)
    w = jax.block_until_ready(w)

    o_ref, w_ref = mha_ref(X, X, X, Wq, Wk, Wv, Wo, H)

    assert o.shape == (B, T, Dm), o.shape
    assert w.shape == (B, H, T, T), w.shape
    assert not np.any(np.isnan(np.asarray(o)))
    assert not np.any(np.isnan(np.asarray(w)))
    assert np.allclose(np.asarray(o), np.asarray(o_ref), rtol=5e-2, atol=1e-2)
    assert np.allclose(np.asarray(w), np.asarray(w_ref), rtol=5e-2, atol=5e-3)
    print("KERNEL_OK")
</pallas_src>

<mosaic_0001>
module attributes {stable_mosaic.version = 11 : i64} {
  func.func @_mha_self_attn_kernel(%arg0: i32, %arg1: memref<2x8x128xf32, #tpu.memory_space<vmem>>, %arg2: memref<384x128xf32, #tpu.memory_space<vmem>>, %arg3: memref<128x128xf32, #tpu.memory_space<vmem>>, %arg4: memref<2x8x128xf32, #tpu.memory_space<vmem>>, %arg5: memref<2x8x32xf32, #tpu.memory_space<vmem>>, %arg6: memref<2x8x128xf32, #tpu.memory_space<vmem>>) attributes {dimension_semantics = [#tpu.dimension_semantics<arbitrary>], iteration_bounds = array<i64: 1>, scalar_prefetch = 0 : i64, scratch_operands = 1 : i64, tpu.core_type = #tpu.core_type<tc>, window_params = [{pipeline_mode = #tpu.pipeline_mode<synchronous>, transform_indices = @transform_0, window_bounds = array<i64: 2, 8, 128>}, {pipeline_mode = #tpu.pipeline_mode<synchronous>, transform_indices = @transform_1, window_bounds = array<i64: 384, 128>}, {pipeline_mode = #tpu.pipeline_mode<synchronous>, transform_indices = @transform_2, window_bounds = array<i64: 128, 128>}, {pipeline_mode = #tpu.pipeline_mode<synchronous>, transform_indices = @transform_3, window_bounds = array<i64: 2, 8, 128>}, {pipeline_mode = #tpu.pipeline_mode<synchronous>, transform_indices = @transform_4, window_bounds = array<i64: 2, 8, 32>}]} {
    %c0 = arith.constant 0 : index
    %c0_0 = arith.constant 0 : index
    %c0_1 = arith.constant 0 : index
    %0 = vector.load %arg1[%c0, %c0_0, %c0_1] : memref<2x8x128xf32, #tpu.memory_space<vmem>>, vector<2x8x128xf32>
    %1 = vector.shape_cast %0 : vector<2x8x128xf32> to vector<16x128xf32>
    %2 = arith.truncf %1 : vector<16x128xf32> to vector<16x128xbf16>
    %c0_2 = arith.constant 0 : index
    %c0_3 = arith.constant 0 : index
    %3 = vector.load %arg2[%c0_2, %c0_3] : memref<384x128xf32, #tpu.memory_space<vmem>>, vector<384x128xf32>
    %4 = arith.truncf %3 : vector<384x128xf32> to vector<384x128xbf16>
    %cst = arith.constant dense<0.000000e+00> : vector<16x384xf32>
    %5 = tpu.matmul %2, %4, %cst {dimension_numbers = #tpu.dot_dimension_numbers<[1], [1], [0], [0], [0, 0, 1, 0], [], []>} : vector<16x128xbf16>, vector<384x128xbf16>, vector<16x384xf32> -> vector<16x384xf32>
    %6 = vector.shape_cast %5 : vector<16x384xf32> to vector<2x8x384xf32>
    %7 = arith.truncf %6 : vector<2x8x384xf32> to vector<2x8x384xbf16>
    %8 = vector.extract_strided_slice %7 {offsets = [0, 0, 0], sizes = [2, 8, 32], strides = [1, 1, 1]} : vector<2x8x384xbf16> to vector<2x8x32xbf16>
    %9 = vector.extract_strided_slice %7 {offsets = [0, 0, 128], sizes = [2, 8, 32], strides = [1, 1, 1]} : vector<2x8x384xbf16> to vector<2x8x32xbf16>
    %10 = vector.extract_strided_slice %7 {offsets = [0, 0, 256], sizes = [2, 8, 32], strides = [1, 1, 1]} : vector<2x8x384xbf16> to vector<2x8x32xbf16>
    "tpu.trace_start"() <{level = 10 : i32, message = "btd,bsd->bts"}> : () -> ()
    %cst_4 = arith.constant dense<0.000000e+00> : vector<2x8x8xf32>
    %11 = tpu.matmul %8, %9, %cst_4 {dimension_numbers = #tpu.dot_dimension_numbers<[2], [2], [1], [1], [0, 0, 0, 1, 1, 1], [0], [0]>} : vector<2x8x32xbf16>, vector<2x8x32xbf16>, vector<2x8x8xf32> -> vector<2x8x8xf32>
    "tpu.trace_stop"() : () -> ()
    %cst_5 = arith.constant 0.176776692 : f32
    %12 = vector.broadcast %cst_5 : f32 to vector<2x8x8xf32>
    %13 = arith.mulf %11, %12 : vector<2x8x8xf32>
    %cst_6 = arith.constant dense<0xFF800000> : vector<2x8xf32>
    %14 = vector.multi_reduction <maximumf>, %13, %cst_6 [2] : vector<2x8x8xf32> to vector<2x8xf32>
    %15 = vector.shape_cast %14 : vector<2x8xf32> to vector<2x8x1xf32>
    %16 = vector.broadcast %15 : vector<2x8x1xf32> to vector<2x8x8xf32>
    %17 = arith.subf %13, %16 : vector<2x8x8xf32>
    %18 = math.exp %17 : vector<2x8x8xf32>
    %cst_7 = arith.constant dense<0.000000e+00> : vector<2x8xf32>
    %19 = vector.multi_reduction <add>, %18, %cst_7 [2] : vector<2x8x8xf32> to vector<2x8xf32>
    %20 = vector.shape_cast %19 : vector<2x8xf32> to vector<2x8x1xf32>
    %21 = vector.broadcast %20 : vector<2x8x1xf32> to vector<2x8x8xf32>
    %22 = arith.divf %18, %21 : vector<2x8x8xf32>
    %23 = arith.truncf %22 : vector<2x8x8xf32> to vector<2x8x8xbf16>
    "tpu.trace_start"() <{level = 10 : i32, message = "bts,bsd->btd"}> : () -> ()
    %cst_8 = arith.constant dense<0.000000e+00> : vector<2x8x32xf32>
    %24 = tpu.matmul %23, %10, %cst_8 {dimension_numbers = #tpu.dot_dimension_numbers<[2], [1], [1], [2], [0, 0, 0, 1, 1, 2], [0], [0]>} : vector<2x8x8xbf16>, vector<2x8x32xbf16>, vector<2x8x32xf32> -> vector<2x8x32xf32>
    "tpu.trace_stop"() : () -> ()
    %c0_9 = arith.constant 0 : index
    %c0_10 = arith.constant 0 : index
    %c0_11 = arith.constant 0 : index
    %25 = vector.load %arg6[%c0_9, %c0_10, %c0_11] : memref<2x8x128xf32, #tpu.memory_space<vmem>>, vector<2x8x32xf32>
    tpu.vector_store %arg6[%c0_9, %c0_10, %c0_11], %24 {strides = array<i32>} : memref<2x8x128xf32, #tpu.memory_space<vmem>>, vector<2x8x32xf32>,
    %26 = vector.extract_strided_slice %7 {offsets = [0, 0, 32], sizes = [2, 8, 32], strides = [1, 1, 1]} : vector<2x8x384xbf16> to vector<2x8x32xbf16>
    %27 = vector.extract_strided_slice %7 {offsets = [0, 0, 160], sizes = [2, 8, 32], strides = [1, 1, 1]} : vector<2x8x384xbf16> to vector<2x8x32xbf16>
    %28 = vector.extract_strided_slice %7 {offsets = [0, 0, 288], sizes = [2, 8, 32], strides = [1, 1, 1]} : vector<2x8x384xbf16> to vector<2x8x32xbf16>
    "tpu.trace_start"() <{level = 10 : i32, message = "btd,bsd->bts"}> : () -> ()
    %cst_12 = arith.constant dense<0.000000e+00> : vector<2x8x8xf32>
    %29 = tpu.matmul %26, %27, %cst_12 {dimension_numbers = #tpu.dot_dimension_numbers<[2], [2], [1], [1], [0, 0, 0, 1, 1, 1], [0], [0]>} : vector<2x8x32xbf16>, vector<2x8x32xbf16>, vector<2x8x8xf32> -> vector<2x8x8xf32>
    "tpu.trace_stop"() : () -> ()
    %cst_13 = arith.constant 0.176776692 : f32
    %30 = vector.broadcast %cst_13 : f32 to vector<2x8x8xf32>
    %31 = arith.mulf %29, %30 : vector<2x8x8xf32>
    %cst_14 = arith.constant dense<0xFF800000> : vector<2x8xf32>
    %32 = vector.multi_reduction <maximumf>, %31, %cst_14 [2] : vector<2x8x8xf32> to vector<2x8xf32>
    %33 = vector.shape_cast %32 : vector<2x8xf32> to vector<2x8x1xf32>
    %34 = vector.broadcast %33 : vector<2x8x1xf32> to vector<2x8x8xf32>
    %35 = arith.subf %31, %34 : vector<2x8x8xf32>
    %36 = math.exp %35 : vector<2x8x8xf32>
    %cst_15 = arith.constant dense<0.000000e+00> : vector<2x8xf32>
    %37 = vector.multi_reduction <add>, %36, %cst_15 [2] : vector<2x8x8xf32> to vector<2x8xf32>
    %38 = vector.shape_cast %37 : vector<2x8xf32> to vector<2x8x1xf32>
    %39 = vector.broadcast %38 : vector<2x8x1xf32> to vector<2x8x8xf32>
    %40 = arith.divf %36, %39 : vector<2x8x8xf32>
    %41 = arith.truncf %40 : vector<2x8x8xf32> to vector<2x8x8xbf16>
    "tpu.trace_start"() <{level = 10 : i32, message = "bts,bsd->btd"}> : () -> ()
    %cst_16 = arith.constant dense<0.000000e+00> : vector<2x8x32xf32>
    %42 = tpu.matmul %41, %28, %cst_16 {dimension_numbers = #tpu.dot_dimension_numbers<[2], [1], [1], [2], [0, 0, 0, 1, 1, 2], [0], [0]>} : vector<2x8x8xbf16>, vector<2x8x32xbf16>, vector<2x8x32xf32> -> vector<2x8x32xf32>
    "tpu.trace_stop"() : () -> ()
    %c0_17 = arith.constant 0 : index
    %c0_18 = arith.constant 0 : index
    %c32 = arith.constant 32 : index
    %43 = vector.load %arg6[%c0_17, %c0_18, %c32] : memref<2x8x128xf32, #tpu.memory_space<vmem>>, vector<2x8x32xf32>
    tpu.vector_store %arg6[%c0_17, %c0_18, %c32], %42 {strides = array<i32>} : memref<2x8x128xf32, #tpu.memory_space<vmem>>, vector<2x8x32xf32>,
    %44 = vector.extract_strided_slice %7 {offsets = [0, 0, 64], sizes = [2, 8, 32], strides = [1, 1, 1]} : vector<2x8x384xbf16> to vector<2x8x32xbf16>
    %45 = vector.extract_strided_slice %7 {offsets = [0, 0, 192], sizes = [2, 8, 32], strides = [1, 1, 1]} : vector<2x8x384xbf16> to vector<2x8x32xbf16>
    %46 = vector.extract_strided_slice %7 {offsets = [0, 0, 320], sizes = [2, 8, 32], strides = [1, 1, 1]} : vector<2x8x384xbf16> to vector<2x8x32xbf16>
    "tpu.trace_start"() <{level = 10 : i32, message = "btd,bsd->bts"}> : () -> ()
    %cst_19 = arith.constant dense<0.000000e+00> : vector<2x8x8xf32>
    %47 = tpu.matmul %44, %45, %cst_19 {dimension_numbers = #tpu.dot_dimension_numbers<[2], [2], [1], [1], [0, 0, 0, 1, 1, 1], [0], [0]>} : vector<2x8x32xbf16>, vector<2x8x32xbf16>, vector<2x8x8xf32> -> vector<2x8x8xf32>
    "tpu.trace_stop"() : () -> ()
    %cst_20 = arith.constant 0.176776692 : f32
    %48 = vector.broadcast %cst_20 : f32 to vector<2x8x8xf32>
    %49 = arith.mulf %47, %48 : vector<2x8x8xf32>
    %cst_21 = arith.constant dense<0xFF800000> : vector<2x8xf32>
    %50 = vector.multi_reduction <maximumf>, %49, %cst_21 [2] : vector<2x8x8xf32> to vector<2x8xf32>
    %51 = vector.shape_cast %50 : vector<2x8xf32> to vector<2x8x1xf32>
    %52 = vector.broadcast %51 : vector<2x8x1xf32> to vector<2x8x8xf32>
    %53 = arith.subf %49, %52 : vector<2x8x8xf32>
    %54 = math.exp %53 : vector<2x8x8xf32>
    %cst_22 = arith.constant dense<0.000000e+00> : vector<2x8xf32>
    %55 = vector.multi_reduction <add>, %54, %cst_22 [2] : vector<2x8x8xf32> to vector<2x8xf32>
    %56 = vector.shape_cast %55 : vector<2x8xf32> to vector<2x8x1xf32>
    %57 = vector.broadcast %56 : vector<2x8x1xf32> to vector<2x8x8xf32>
    %58 = arith.divf %54, %57 : vector<2x8x8xf32>
    %59 = arith.truncf %58 : vector<2x8x8xf32> to vector<2x8x8xbf16>
    "tpu.trace_start"() <{level = 10 : i32, message = "bts,bsd->btd"}> : () -> ()
    %cst_23 = arith.constant dense<0.000000e+00> : vector<2x8x32xf32>
    %60 = tpu.matmul %59, %46, %cst_23 {dimension_numbers = #tpu.dot_dimension_numbers<[2], [1], [1], [2], [0, 0, 0, 1, 1, 2], [0], [0]>} : vector<2x8x8xbf16>, vector<2x8x32xbf16>, vector<2x8x32xf32> -> vector<2x8x32xf32>
    "tpu.trace_stop"() : () -> ()
    %c0_24 = arith.constant 0 : index
    %c0_25 = arith.constant 0 : index
    %c64 = arith.constant 64 : index
    %61 = vector.load %arg6[%c0_24, %c0_25, %c64] : memref<2x8x128xf32, #tpu.memory_space<vmem>>, vector<2x8x32xf32>
    tpu.vector_store %arg6[%c0_24, %c0_25, %c64], %60 {strides = array<i32>} : memref<2x8x128xf32, #tpu.memory_space<vmem>>, vector<2x8x32xf32>,
    %62 = vector.extract_strided_slice %7 {offsets = [0, 0, 96], sizes = [2, 8, 32], strides = [1, 1, 1]} : vector<2x8x384xbf16> to vector<2x8x32xbf16>
    %63 = vector.extract_strided_slice %7 {offsets = [0, 0, 224], sizes = [2, 8, 32], strides = [1, 1, 1]} : vector<2x8x384xbf16> to vector<2x8x32xbf16>
    %64 = vector.extract_strided_slice %7 {offsets = [0, 0, 352], sizes = [2, 8, 32], strides = [1, 1, 1]} : vector<2x8x384xbf16> to vector<2x8x32xbf16>
    "tpu.trace_start"() <{level = 10 : i32, message = "btd,bsd->bts"}> : () -> ()
    %cst_26 = arith.constant dense<0.000000e+00> : vector<2x8x8xf32>
    %65 = tpu.matmul %62, %63, %cst_26 {dimension_numbers = #tpu.dot_dimension_numbers<[2], [2], [1], [1], [0, 0, 0, 1, 1, 1], [0], [0]>} : vector<2x8x32xbf16>, vector<2x8x32xbf16>, vector<2x8x8xf32> -> vector<2x8x8xf32>
    "tpu.trace_stop"() : () -> ()
    %cst_27 = arith.constant 0.176776692 : f32
    %66 = vector.broadcast %cst_27 : f32 to vector<2x8x8xf32>
    %67 = arith.mulf %65, %66 : vector<2x8x8xf32>
    %cst_28 = arith.constant dense<0xFF800000> : vector<2x8xf32>
    %68 = vector.multi_reduction <maximumf>, %67, %cst_28 [2] : vector<2x8x8xf32> to vector<2x8xf32>
    %69 = vector.shape_cast %68 : vector<2x8xf32> to vector<2x8x1xf32>
    %70 = vector.broadcast %69 : vector<2x8x1xf32> to vector<2x8x8xf32>
    %71 = arith.subf %67, %70 : vector<2x8x8xf32>
    %72 = math.exp %71 : vector<2x8x8xf32>
    %cst_29 = arith.constant dense<0.000000e+00> : vector<2x8xf32>
    %73 = vector.multi_reduction <add>, %72, %cst_29 [2] : vector<2x8x8xf32> to vector<2x8xf32>
    %74 = vector.shape_cast %73 : vector<2x8xf32> to vector<2x8x1xf32>
    %75 = vector.broadcast %74 : vector<2x8x1xf32> to vector<2x8x8xf32>
    %76 = arith.divf %72, %75 : vector<2x8x8xf32>
    %77 = arith.truncf %76 : vector<2x8x8xf32> to vector<2x8x8xbf16>
    "tpu.trace_start"() <{level = 10 : i32, message = "bts,bsd->btd"}> : () -> ()
    %cst_30 = arith.constant dense<0.000000e+00> : vector<2x8x32xf32>
    %78 = tpu.matmul %77, %64, %cst_30 {dimension_numbers = #tpu.dot_dimension_numbers<[2], [1], [1], [2], [0, 0, 0, 1, 1, 2], [0], [0]>} : vector<2x8x8xbf16>, vector<2x8x32xbf16>, vector<2x8x32xf32> -> vector<2x8x32xf32>
    "tpu.trace_stop"() : () -> ()
    %c0_31 = arith.constant 0 : index
    %c0_32 = arith.constant 0 : index
    %c96 = arith.constant 96 : index
    %79 = vector.load %arg6[%c0_31, %c0_32, %c96] : memref<2x8x128xf32, #tpu.memory_space<vmem>>, vector<2x8x32xf32>
    tpu.vector_store %arg6[%c0_31, %c0_32, %c96], %78 {strides = array<i32>} : memref<2x8x128xf32, #tpu.memory_space<vmem>>, vector<2x8x32xf32>,
    %80 = tpu.concatenate %22, %40, %58, %76 in 2 : vector<2x8x8xf32>, vector<2x8x8xf32>, vector<2x8x8xf32>, vector<2x8x8xf32> -> vector<2x8x32xf32>
    %c0_33 = arith.constant 0 : index
    %c0_34 = arith.constant 0 : index
    %c0_35 = arith.constant 0 : index
    %81 = vector.load %arg5[%c0_33, %c0_34, %c0_35] : memref<2x8x32xf32, #tpu.memory_space<vmem>>, vector<2x8x32xf32>
    tpu.vector_store %arg5[%c0_33, %c0_34, %c0_35], %80 {strides = array<i32>} : memref<2x8x32xf32, #tpu.memory_space<vmem>>, vector<2x8x32xf32>,
    %c0_36 = arith.constant 0 : index
    %c0_37 = arith.constant 0 : index
    %c0_38 = arith.constant 0 : index
    %82 = vector.load %arg6[%c0_36, %c0_37, %c0_38] : memref<2x8x128xf32, #tpu.memory_space<vmem>>, vector<2x8x128xf32>
    %83 = vector.shape_cast %82 : vector<2x8x128xf32> to vector<16x128xf32>
    %84 = arith.truncf %83 : vector<16x128xf32> to vector<16x128xbf16>
    %c0_39 = arith.constant 0 : index
    %c0_40 = arith.constant 0 : index
    %85 = vector.load %arg3[%c0_39, %c0_40] : memref<128x128xf32, #tpu.memory_space<vmem>>, vector<128x128xf32>
    %86 = arith.truncf %85 : vector<128x128xf32> to vector<128x128xbf16>
    %cst_41 = arith.constant dense<0.000000e+00> : vector<16x128xf32>
    %87 = tpu.matmul %84, %86, %cst_41 {dimension_numbers = #tpu.dot_dimension_numbers<[1], [1], [0], [0], [0, 0, 1, 0], [], []>} : vector<16x128xbf16>, vector<128x128xbf16>, vector<16x128xf32> -> vector<16x128xf32>
    %88 = vector.shape_cast %87 : vector<16x128xf32> to vector<2x8x128xf32>
    %c0_42 = arith.constant 0 : index
    %c0_43 = arith.constant 0 : index
    %c0_44 = arith.constant 0 : index
    %89 = vector.load %arg4[%c0_42, %c0_43, %c0_44] : memref<2x8x128xf32, #tpu.memory_space<vmem>>, vector<2x8x128xf32>
    tpu.vector_store %arg4[%c0_42, %c0_43, %c0_44], %88 {strides = array<i32>} : memref<2x8x128xf32, #tpu.memory_space<vmem>>, vector<2x8x128xf32>,
    return
  }
  func.func @transform_0(%arg0: i32) -> (i32, i32, i32) {
    %c0_i32 = arith.constant 0 : i32
    %c0_i32_0 = arith.constant 0 : i32
    %c0_i32_1 = arith.constant 0 : i32
    %c0_i32_2 = arith.constant 0 : i32
    return %c0_i32, %c0_i32_0, %c0_i32_1 : i32, i32, i32
  }
  func.func @transform_1(%arg0: i32) -> (i32, i32) {
    %c0_i32 = arith.constant 0 : i32
    %c0_i32_0 = arith.constant 0 : i32
    %c0_i32_1 = arith.constant 0 : i32
    return %c0_i32, %c0_i32_0 : i32, i32
  }
  func.func @transform_2(%arg0: i32) -> (i32, i32) {
    %c0_i32 = arith.constant 0 : i32
    %c0_i32_0 = arith.constant 0 : i32
    %c0_i32_1 = arith.constant 0 : i32
    return %c0_i32, %c0_i32_0 : i32, i32
  }
  func.func @transform_3(%arg0: i32) -> (i32, i32, i32) {
    %c0_i32 = arith.constant 0 : i32
    %c0_i32_0 = arith.constant 0 : i32
    %c0_i32_1 = arith.constant 0 : i32
    %c0_i32_2 = arith.constant 0 : i32
    return %c0_i32, %c0_i32_0, %c0_i32_1 : i32, i32, i32
  }
  func.func @transform_4(%arg0: i32) -> (i32, i32, i32) {
    %c0_i32 = arith.constant 0 : i32
    %c0_i32_0 = arith.constant 0 : i32
    %c0_i32_1 = arith.constant 0 : i32
    %c0_i32_2 = arith.constant 0 : i32
    return %c0_i32, %c0_i32_0, %c0_i32_1 : i32, i32, i32
  }
}

</mosaic_0001>

<bundles_post_ra>
// kernel: tpu_custom_call.1
= control target key start
LH: loop header
LB: loop body
LE: loop exit
PB: predicated region body
PF: predicated region fallthrough
CT: control target
= control target key end

     0   :  { %10 = vsyncpa [#allocation4], 0  ;;  %s1957_s0 = inlined_call_operand.hbm [shape: f32[2,8,128], index: 0, kind: input, shape index: {}]   ;;  %s1958_s1 = inlined_call_operand.hbm [shape: f32[384,128], index: 1, kind: input, shape index: {}]   ;;  %s1959_s2 = inlined_call_operand.hbm [shape: f32[128,128], index: 2, kind: input, shape index: {}]   ;;  %s1960_s3 = inlined_call_operand.hbm [shape: f32[2,8,128], index: 3, kind: output, shape index: {0}]   ;;  %s1961_s4 = inlined_call_operand.hbm [shape: f32[2,8,32], index: 4, kind: output, shape index: {1}]  }
   0x1   :  { %11 = vsyncpa [#allocation7], 0 }
   0x2   :  { %12 = vsyncpa [#allocation5], 0 }
   0x3   :  { %13 = vsyncpa [#allocation11], 0  ;;  %s1657_s15 = smov [#allocation6]   ;;  %s1658_s17 = smov [#allocation3]  }
   0x4   :  { %s31_s16 = sshll.u32 %s1657_s15, 4  ;;  %s19_s18 = sshll.u32 %s1658_s17, 4  ;;  %s32_s16 = int_to_ptr.vmem [resolvable:$true] %s31_s16  ;;  %s20_s18 = int_to_ptr.vmem [resolvable:$true] %s19_s18 }
   0x5   :  { %s1557_s19 = scalar_lea.vmem %s32_s16, 6144  ;;  %p1562_p1 = scmp.lt.s32.totalorder %s32_s16, %s32_s16 }
   0x6   :  { %p1558_p0 = scmp.ne.s32.totalorder %s32_s16, %s1557_s19  ;;  %p1563_p2 = scmp.lt.s32.totalorder %s1557_s19, %s1557_s19 }
   0x8   :  { %p1564_p3 = por %p1563_p2, %p1562_p1 }
   0xa   :  { %p1565_p4 = pnand %p1564_p3, %p1558_p0 }
   0xc   :  { %1568 = shalt.err (!%p1565_p4)
}
   0xd   :  { %s1659_s20 = smov 128   ;;  %s1660_s21 = smov 8  }
   0xe   :  { %37 = dma.hbm_to_vmem [thread:$0]  %s1958_s1, 6144, %s32_s16, [#allocation7], %s1659_s20, %s1659_s20, %s1660_s21  }
   0xf   :  { %s1577_s24 = scalar_lea.vmem %s20_s18, 256  ;;  %p1582_p6 = scmp.lt.s32.totalorder %s20_s18, %s20_s18 }
  0x10   :  { %p1578_p5 = scmp.ne.s32.totalorder %s20_s18, %s1577_s24  ;;  %p1583_p7 = scmp.lt.s32.totalorder %s1577_s24, %s1577_s24 }
  0x12   :  { %p1584_p8 = por %p1583_p7, %p1582_p6 }
  0x14   :  { %p1585_p9 = pnand %p1584_p8, %p1578_p5 }
  0x16   :  { %1588 = shalt.err (!%p1585_p9)
}
  0x17   :  { %25 = dma.hbm_to_vmem [thread:$0]  %s1957_s0, 256, %s20_s18, [#allocation4], %s1659_s20, %s1659_s20, %s1660_s21  }
  0x18   :  { %s1661_s27 = smov [#allocation8]  }
  0x19   :  { %s43_s28 = sshll.u32 %s1661_s27, 4  ;;  %s44_s28 = int_to_ptr.vmem [resolvable:$true] %s43_s28 }
  0x1a   :  { %s1597_s29 = scalar_lea.vmem %s44_s28, 2048  ;;  %p1602_p11 = scmp.lt.s32.totalorder %s44_s28, %s44_s28 }
  0x1b   :  { %p1598_p10 = scmp.ne.s32.totalorder %s44_s28, %s1597_s29  ;;  %p1603_p12 = scmp.lt.s32.totalorder %s1597_s29, %s1597_s29 }
  0x1d   :  { %p1604_p13 = por %p1603_p12, %p1602_p11 }
  0x1f   :  { %p1605_p0 = pnand %p1604_p13, %p1598_p10 }
  0x21   :  { %1608 = shalt.err (!%p1605_p0)
}
  0x22   :  { %49 = dma.hbm_to_vmem [thread:$0]  %s1959_s2, 2048, %s44_s28, [#allocation7], %s1659_s20, %s1659_s20, %s1660_s21  }
  0x23   :  { %1649 = dma.done.wait [#allocation4], 256  }
  0x24   :  { %1650 = vsyncadd [#allocation4], 4294967040 }
  0x25   :  { %1651 = dma.done.wait [#allocation7], 8192  }
  0x26   :  { %1652 = vsyncadd [#allocation7], 4294959104  ;;  %v1662_v0 = vmov 0.0   ;;  %vm1663_vm0 = vmmov 0   ;;  %v93_v1 = vld [vmem:[#allocation6 + $0xf0] sm:$0xff]  ;;  %v94_v2 = vld [vmem:[#allocation6 + $0xf8] sm:$0xff] }
  0x27   :  { %1367 = vmatprep.subr.bf16.mxu1 %v1662_v0  ;;  %1383 = vmatprep.mubr.msk.bf16.mxu1 %vm1663_vm0, %v1662_v0  ;;  %v77_v3 = vld [vmem:[#allocation6 + $0x70] sm:$0xff]  ;;  %v126_v4 = vpack.c.bf16 %v94_v2, %v93_v1  ;;  %v78_v5 = vld [vmem:[#allocation6 + $0x78] sm:$0xff]  ;;  %v91_v6 = vld [vmem:[#allocation6 + $0xe0] sm:$0xff]  ;;  %vm225_vm1 = vcmask 261120   ;;  %vm348_vm2 = vcmask 1043456   ;;  %vm320_vm3 = vcmask 64512  }
  0x28   :  { %v92_v7 = vld [vmem:[#allocation6 + $0xe8] sm:$0xff]  ;;  %v118_v8 = vpack.c.bf16 %v78_v5, %v77_v3  ;;  %v75_v10 = vld [vmem:[#allocation6 + $0x60] sm:$0xff]  ;;  %v89_v12 = vld [vmem:[#allocation6 + $0xd0] sm:$0xff]  ;;  %s1664_s0 = smov 96   ;;  %s1665_s2 = smov 64   ;;  %vm676_vm4 = vcmask 523520  }
  0x29   :  { %v125_v9 = vpack.c.bf16 %v92_v7, %v91_v6  ;;  %1299 = vmatprep.subr.bf16.mxu0 %v126_v4  ;;  %v76_v11 = vld [vmem:[#allocation6 + $0x68] sm:$0xff]  ;;  %v90_v13 = vld [vmem:[#allocation6 + $0xd8] sm:$0xff]  ;;  %v60_v16 = vld [vmem:[#allocation3] sm:$0xff]  ;;  %s1666_s5 = smov 32   ;;  %vm909_vm5 = vcmask 785920   ;;  %s1667_s6 = smov 16  }
  0x2a   :  { %1300 = vmatpush3.bf16.xpose.msra.mxu0 %v118_v8  ;;  %v117_v14 = vpack.c.bf16 %v76_v11, %v75_v10  ;;  %v124_v15 = vpack.c.bf16 %v90_v13, %v89_v12  ;;  %v61_v17 = vld [vmem:[#allocation3 + $0x8] sm:$0xff]  ;;  %v109_v18 = vld [vmem:[#allocation6 + $0x170] sm:$0xff]  ;;  %v87_v24 = vld [vmem:[#allocation6 + $0xc0] sm:$0xff]  ;;  %s1668_s7 = smov 24   ;;  %vm1142_vm6 = vcmask 1048320   ;;  %vm1171_vm7 = vcmask 130048  }
  0x2b   :  { %1301 = vmatprep.subr.bf16.mxu0 %v125_v9  ;;  %v110_v19 = vld [vmem:[#allocation6 + $0x178] sm:$0xff]  ;;  %v1717_v20 = vpack.c.bf16 %v61_v17, %v60_v16  ;;  %v73_v22 = vld [vmem:[#allocation6 + $0x50] sm:$0xff]  ;;  %v88_v25 = vld [vmem:[#allocation6 + $0xc8] sm:$0xff]  ;;  %vm1174_vm8 = vcmask 195584   ;;  %s1669_s8 = smov [#allocation10]  }
  0x2c   :  { %v134_v21 = vpack.c.bf16 %v110_v19, %v109_v18  ;;  %v74_v23 = vld [vmem:[#allocation6 + $0x58] sm:$0xff]  ;;  %v107_v26 = vld [vmem:[#allocation6 + $0x160] sm:$0xff]  ;;  %v108_v27 = vld [vmem:[#allocation6 + $0x168] sm:$0xff]  ;;  %v123_v29 = vpack.c.bf16 %v88_v25, %v87_v24  ;;  %s1266_s9 = sshll.u32 %s1669_s8, 4  ;;  %s1267_s9 = int_to_ptr.vmem [resolvable:$true] %s1266_s9 }
  0x2d   :  { %1315 = vmatprep.mubr.bf16.mxu0 %v1717_v20  ;;  %v116_v28 = vpack.c.bf16 %v74_v23, %v73_v22  ;;  %v133_v30 = vpack.c.bf16 %v108_v27, %v107_v26  ;;  %v71_v31 = vld [vmem:[#allocation6 + $0x40] sm:$0xff]  ;;  %v72_v32 = vld [vmem:[#allocation6 + $0x48] sm:$0xff]  ;;  %v85_v33 = vld [vmem:[#allocation6 + $0xb0] sm:$0xff]  ;;  %s1609_s10 = scalar_lea.vmem %s1267_s9, 256  ;;  %p1614_p2 = scmp.lt.s32.totalorder %s1267_s9, %s1267_s9 }
  0x2e   :  { %1368 = vmatpush3.bf16.xpose.msra.mxu1 %v134_v21  ;;  %v86_v34 = vld [vmem:[#allocation6 + $0xb8] sm:$0xff]  ;;  %v105_v35 = vld [vmem:[#allocation6 + $0x150] sm:$0xff]  ;;  %v115_v37 = vpack.c.bf16 %v72_v32, %v71_v31  ;;  %v83_v42 = vld [vmem:[#allocation6 + $0xa0] sm:$0xff]  ;;  %p1610_p1 = scmp.ne.s32.totalorder %s1267_s9, %s1609_s10  ;;  %p1615_p3 = scmp.lt.s32.totalorder %s1609_s10, %s1609_s10 }
  0x2f   :  { %1369 = vmatprep.subr.bf16.mxu1 %v1662_v0  ;;  %v106_v36 = vld [vmem:[#allocation6 + $0x158] sm:$0xff]  ;;  %v122_v38 = vpack.c.bf16 %v86_v34, %v85_v33  ;;  %v69_v40 = vld [vmem:[#allocation6 + $0x30] sm:$0xff]  ;;  %v84_v43 = vld [vmem:[#allocation6 + $0xa8] sm:$0xff] }
  0x30   :  { %v132_v39 = vpack.c.bf16 %v106_v36, %v105_v35  ;;  %v70_v41 = vld [vmem:[#allocation6 + $0x38] sm:$0xff]  ;;  %v103_v44 = vld [vmem:[#allocation6 + $0x140] sm:$0xff]  ;;  %v104_v45 = vld [vmem:[#allocation6 + $0x148] sm:$0xff]  ;;  %v121_v47 = vpack.c.bf16 %v84_v43, %v83_v42  ;;  %p1616_p4 = por %p1615_p3, %p1614_p2 }
  0x31   :  { %v114_v46 = vpack.c.bf16 %v70_v41, %v69_v40  ;;  %v131_v48 = vpack.c.bf16 %v104_v45, %v103_v44  ;;  %v67_v49 = vld [vmem:[#allocation6 + $0x20] sm:$0xff]  ;;  %v68_v50 = vld [vmem:[#allocation6 + $0x28] sm:$0xff]  ;;  %v81_v51 = vld [vmem:[#allocation6 + $0x90] sm:$0xff] }
  0x32   :  { %1302 = vmatpush3.bf16.xpose.msra.mxu0 %v117_v14  ;;  %v82_v52 = vld [vmem:[#allocation6 + $0x98] sm:$0xff]  ;;  %v101_v53 = vld [vmem:[#allocation6 + $0x130] sm:$0xff]  ;;  %v113_v55 = vpack.c.bf16 %v68_v50, %v67_v49  ;;  %v79_v60 = vld [vmem:[#allocation6 + $0x80] sm:$0xff]  ;;  %p1617_p5 = pnand %p1616_p4, %p1610_p1 }
  0x33   :  { %1303 = vmatprep.subr.bf16.mxu0 %v124_v15  ;;  %v102_v54 = vld [vmem:[#allocation6 + $0x138] sm:$0xff]  ;;  %v120_v56 = vpack.c.bf16 %v82_v52, %v81_v51  ;;  %v65_v58 = vld [vmem:[#allocation6 + $0x10] sm:$0xff]  ;;  %v80_v61 = vld [vmem:[#allocation6 + $0x88] sm:$0xff] }
  0x34   :  { %v130_v57 = vpack.c.bf16 %v102_v54, %v101_v53  ;;  %v66_v59 = vld [vmem:[#allocation6 + $0x18] sm:$0xff]  ;;  %v99_v62 = vld [vmem:[#allocation6 + $0x120] sm:$0xff]  ;;  %v100_v63 = vld [vmem:[#allocation6 + $0x128] sm:$0xff]  ;;  %v119_v2 = vpack.c.bf16 %v80_v61, %v79_v60 }
  0x35   :  { %v112_v1 = vpack.c.bf16 %v66_v59, %v65_v58  ;;  %v129_v3 = vpack.c.bf16 %v100_v63, %v99_v62  ;;  %v63_v4 = vld [vmem:[#allocation6] sm:$0xff]  ;;  %v64_v5 = vld [vmem:[#allocation6 + $0x8] sm:$0xff]  ;;  %v97_v6 = vld [vmem:[#allocation6 + $0x110] sm:$0xff] }
  0x36   :  { %1370 = vmatpush3.bf16.xpose.msra.mxu1 %v133_v30  ;;  %v98_v7 = vld [vmem:[#allocation6 + $0x118] sm:$0xff]  ;;  %v111_v8 = vpack.c.bf16 %v64_v5, %v63_v4  ;;  %v95_v10 = vld [vmem:[#allocation6 + $0x100] sm:$0xff]  ;;  %v96_v11 = vld [vmem:[#allocation6 + $0x108] sm:$0xff] }
  0x37   :  { %1371 = vmatprep.subr.bf16.mxu1 %v1662_v0  ;;  %v128_v9 = vpack.c.bf16 %v98_v7, %v97_v6  ;;  %v127_v12 = vpack.c.bf16 %v96_v11, %v95_v10 }
  0x3a   :  { %1304 = vmatpush3.bf16.xpose.msra.mxu0 %v116_v28 }
  0x3b   :  { %1305 = vmatprep.subr.bf16.mxu0 %v123_v29 }
  0x3e   :  { %1372 = vmatpush3.bf16.xpose.msra.mxu1 %v132_v39 }
  0x3f   :  { %1373 = vmatprep.subr.bf16.mxu1 %v1662_v0 }
  0x42   :  { %1306 = vmatpush3.bf16.xpose.msra.mxu0 %v115_v37 }
  0x43   :  { %1307 = vmatprep.subr.bf16.mxu0 %v122_v38 }
  0x46   :  { %1374 = vmatpush3.bf16.xpose.msra.mxu1 %v131_v48 }
  0x47   :  { %1375 = vmatprep.subr.bf16.mxu1 %v1662_v0 }
  0x4a   :  { %1308 = vmatpush3.bf16.xpose.msra.mxu0 %v114_v46 }
  0x4b   :  { %1309 = vmatprep.subr.bf16.mxu0 %v121_v47 }
  0x4e   :  { %1376 = vmatpush3.bf16.xpose.msra.mxu1 %v130_v57 }
  0x4f   :  { %1377 = vmatprep.subr.bf16.mxu1 %v1662_v0 }
  0x52   :  { %1310 = vmatpush3.bf16.xpose.msra.mxu0 %v113_v55 }
  0x53   :  { %1311 = vmatprep.subr.bf16.mxu0 %v120_v56 }
  0x56   :  { %1378 = vmatpush3.bf16.xpose.msra.mxu1 %v129_v3 }
  0x57   :  { %1379 = vmatprep.subr.bf16.mxu1 %v1662_v0 }
  0x5a   :  { %1312 = vmatpush3.bf16.xpose.msra.mxu0 %v112_v1 }
  0x5b   :  { %1313 = vmatprep.subr.bf16.mxu0 %v119_v2 }
  0x5e   :  { %1380 = vmatpush3.bf16.xpose.msra.mxu1 %v128_v9 }
  0x5f   :  { %1381 = vmatprep.subr.bf16.mxu1 %v1662_v0 }
  0x62   :  { %1314 = vmatpush3.bf16.xpose.msra.mxu0 %v111_v8 }
  0x63   :  { %1435 = vmatprep.subr.bf16.mxu0 %v1662_v0 }
  0x66   :  { %1382 = vmatpush3.bf16.xpose.msra.mxu1 %v127_v12 }
  0x67   :  { %1387 = vmatprep.subr.bf16.mxu1 %v1662_v0 }
  0x69   :  { %1316 = vmatmul.mubr.bf16.vlgmr.msra.gmra.mxu0 %v1717_v20 }
  0x6a   :  { %1437 = vmatprep.mubr.msk.bf16.mxu0 %vm1663_vm0, %v1662_v0 }
  0x6d   :  { %1384 = vmatmul.mubr.bf16.vlgmr.msra.gmra.mxu1 %v1717_v20 }
  0x6e   :  { %1389 = vmatprep.mubr.msk.bf16.mxu1 %vm1663_vm0, %v1662_v0 }
 0x129   :  { %v169_v13 = vpop.f32.mrf.mxu0 }
 0x12a   :  { %v1742_v20 = vpack.c.bf16 %v169_v13, %v169_v13 }
 0x12b   :  { %v171_v14 = vpop.f32.mrf.mxu0 }
 0x12c   :  { %v1735_v15 = vpack.c.bf16 %v171_v14, %v171_v14 }
 0x12d   :  { %v173_v16 = vpop.f32.mrf.mxu0  ;;  %v212_v21 = vpop.f32.mrf.mxu1 }
 0x12e   :  { %v230_v17 = vsel %vm225_vm1, %v1735_v15, 0  ;;  %v1750_v25 = vpack.c.bf16 %v212_v21, %v212_v21  ;;  %v1753_v27 = vpack.c.bf16 %v173_v16, %v173_v16 }
 0x12f   :  { %v175_v18 = vpop.f32.mrf.mxu0  ;;  %1388 = vmatpush3.bf16.xpose.msra.mxu1 %v230_v17  ;;  %v1385_v22 = vpop.f32.mrf.mxu1 }
 0x130   :  { %1393 = vmatprep.subr.bf16.mxu1 %v1662_v0  ;;  %v1740_v19 = vpack.c.bf16 %v175_v18, %v175_v18  ;;  %v350_v28 = vsel %vm348_vm2, %v1750_v25, 0 }
 0x131   :  { %v215_v24 = vpop.f32.mrf.mxu1 }
 0x132   :  { %v276_v23 = vsel %vm225_vm1, %v1740_v19, 0  ;;  %v1774_v54 = vpack.c.bf16 %v215_v24, %v215_v24 }
 0x133   :  { %v1386_v26 = vpop.f32.mrf.mxu1 }
 0x134   :  { %v396_v57 = vsel %vm348_vm2, %v1774_v54, 0 }
 0x136   :  { %1390 = vmatmul.mubr.msk.bf16.vlgmr.msra.gmra.mxu1 %vm225_vm1, %v1742_v20 }
 0x137   :  { %1394 = vmatpush3.bf16.xpose.msra.mxu1 %v276_v23  ;;  %1395 = vmatprep.mubr.msk.bf16.mxu1 %vm1663_vm0, %v1662_v0 }
 0x138   :  { %1399 = vmatprep.subr.bf16.mxu1 %v1662_v0 }
 0x13e   :  { %1396 = vmatmul.mubr.msk.bf16.vlgmr.msra.gmra.mxu1 %vm225_vm1, %v1753_v27 }
 0x13f   :  { %1400 = vmatpush3.bf16.msra.mxu1 %v350_v28  ;;  %1401 = vmatprep.mubr.msk.bf16.mxu1 %vm1663_vm0, %v1662_v0 }
 0x140   :  { %1405 = vmatprep.subr.bf16.mxu1 %v1662_v0 }
 0x1f6   :  { %v266_v29 = vpop.f32.mrf.mxu1 }
 0x1f7   :  { %v318_v30 = vmul.f32 0.17677669, %v266_v29 }
 0x1f8   :  { %v1391_v31 = vpop.f32.mrf.mxu1 }
 0x1f9   :  { %v321_v32 = vsel %vm320_vm3, %v318_v30, -inf }
 0x1fa   :  { %322 = vmax.xlane.f32.xlu0 %v321_v32  ;;  %v269_v33 = vpop.f32.mrf.mxu1 }
 0x1fc   :  { %v1392_v34 = vpop.f32.mrf.mxu1 }
 0x1fe   :  { %v312_v35 = vpop.f32.mrf.mxu1 }
 0x1ff   :  { %v319_v36 = vmul.f32 0.17677669, %v312_v35 }
 0x200   :  { %v1397_v37 = vpop.f32.mrf.mxu1 }
 0x201   :  { %v324_v38 = vsel %vm320_vm3, %v319_v36, -inf }
 0x202   :  { %325 = vmax.xlane.f32.xlu0 %v324_v38  ;;  %v315_v39 = vpop.f32.mrf.mxu1 }
 0x204   :  { %v1398_v40 = vpop.f32.mrf.mxu1 }
 0x218   :  { %444 = vrot.lane.b32.xlu0 %v1735_v15, %s1664_s0 }
 0x283   :  { %v323_v41 = vpop.xlane.xlu0 %322 }
 0x284   :  { %v327_v42 = vsub.f32 %v318_v30, %v323_v41 }
 0x286   :  { %v329_v43 = vmul.f32 1.442695, %v327_v42 }
 0x288   :  { %1517 = vpow2.f32 %v329_v43 }
 0x28b   :  { %v326_v44 = vpop.xlane.xlu0 %325 }
 0x28c   :  { %v328_v45 = vsub.f32 %v319_v36, %v326_v44 }
 0x28e   :  { %v331_v46 = vmul.f32 1.442695, %v328_v45 }
 0x28f   :  { %v445_v60 = vpop.permute.xlu0 %444 }
 0x290   :  { %1519 = vpow2.f32 %v331_v46  ;;  %v450_v63 = vsel %vm225_vm1, %v445_v60, 0 }
 0x295   :  { %v1518_v47 = vpop.eup %1517 }
 0x296   :  { %v333_v48 = vsel %vm320_vm3, %v1518_v47, 0.0 }
 0x297   :  { %334 = vadd.xlane.f32.xlu1 %v333_v48 }
 0x29d   :  { %v1520_v49 = vpop.eup %1519 }
 0x29e   :  { %v336_v50 = vsel %vm320_vm3, %v1520_v49, 0.0 }
 0x29f   :  { %337 = vadd.xlane.f32.xlu1 %v336_v50 }
 0x2b0   :  { %441 = vrot.lane.b32.xlu1 %v1742_v20, %s1664_s0 }
 0x2b4   :  { %496 = vrot.lane.b32.xlu1 %v1740_v19, %s1664_s0 }
 0x2b8   :  { %493 = vrot.lane.b32.xlu1 %v1753_v27, %s1664_s0 }
 0x320   :  { %v335_v51 = vpop.xlane.xlu1 %334 }
 0x321   :  { %1521 = vrcp.f32 %v335_v51 }
 0x328   :  { %v338_v52 = vpop.xlane.xlu1 %337 }
 0x329   :  { %1523 = vrcp.f32 %v338_v52 }
 0x32c   :  { %v442_v62 = vpop.permute.xlu1 %441 }
 0x32e   :  { %v1522_v53 = vpop.eup %1521 }
 0x32f   :  { %v1776_v55 = vmul.f32 %v1522_v53, %v1518_v47 }
 0x330   :  { %v497_v1 = vpop.permute.xlu1 %496 }
 0x331   :  { %v343_v56 = vpack.c.bf16 %v1776_v55, %v1776_v55  ;;  %v502_v2 = vsel %vm225_vm1, %v497_v1, 0 }
 0x333   :  { %1402 = vmatmul.mubr.msk.bf16.vlgmr.msra.gmra.mxu1 %vm320_vm3, %v343_v56 }
 0x334   :  { %1406 = vmatpush3.bf16.msra.mxu1 %v396_v57  ;;  %1407 = vmatprep.mubr.msk.bf16.mxu1 %vm1663_vm0, %v1662_v0  ;;  %v494_v3 = vpop.permute.xlu1 %493 }
 0x335   :  { %1411 = vmatprep.subr.bf16.mxu1 %v1662_v0 }
 0x336   :  { %v1524_v58 = vpop.eup %1523 }
 0x337   :  { %v1786_v59 = vmul.f32 %v1524_v58, %v1520_v49 }
 0x339   :  { %v344_v61 = vpack.c.bf16 %v1786_v59, %v1786_v59 }
 0x33b   :  { %1408 = vmatmul.mubr.msk.bf16.vlgmr.msra.gmra.mxu1 %vm320_vm3, %v344_v61 }
 0x33c   :  { %1412 = vmatpush3.bf16.xpose.msra.mxu1 %v450_v63  ;;  %1413 = vmatprep.mubr.msk.bf16.mxu1 %vm1663_vm0, %v1662_v0 }
 0x33d   :  { %1417 = vmatprep.subr.bf16.mxu1 %v1662_v0 }
 0x343   :  { %1414 = vmatmul.mubr.msk.bf16.vlgmr.msra.gmra.mxu1 %vm225_vm1, %v442_v62 }
 0x344   :  { %1418 = vmatpush3.bf16.xpose.msra.mxu1 %v502_v2  ;;  %1419 = vmatprep.mubr.msk.bf16.mxu1 %vm1663_vm0, %v1662_v0 }
 0x345   :  { %1423 = vmatprep.subr.bf16.mxu1 %v1662_v0 }
 0x34b   :  { %1420 = vmatmul.mubr.msk.bf16.vlgmr.msra.gmra.mxu1 %vm225_vm1, %v494_v3 }
 0x34c   :  { %1425 = vmatprep.mubr.msk.bf16.mxu1 %vm1663_vm0, %v1662_v0 }
 0x3f3   :  { %v386_v4 = vpop.f32.mrf.mxu1 }
 0x3f4   :  { %438 = vst.msk [vmem:[#allocation2] sm:$0xff] %vm225_vm1, %v386_v4 }
 0x3f5   :  { %v1403_v5 = vpop.f32.mrf.mxu1 }
 0x3f7   :  { %v389_v6 = vpop.f32.mrf.mxu1 }
 0x3f9   :  { %v1404_v7 = vpop.f32.mrf.mxu1 }
 0x3fb   :  { %v432_v8 = vpop.f32.mrf.mxu1 }
 0x3fc   :  { %439 = vst.msk [vmem:[#allocation2 + $0x8] sm:$0xff] %vm225_vm1, %v432_v8 }
 0x3fd   :  { %v1409_v9 = vpop.f32.mrf.mxu1 }
 0x3ff   :  { %v435_v10 = vpop.f32.mrf.mxu1 }
 0x401   :  { %v1410_v11 = vpop.f32.mrf.mxu1 }
 0x403   :  { %v486_v12 = vpop.f32.mrf.mxu1 }
 0x404   :  { %v544_v13 = vmul.f32 0.17677669, %v486_v12 }
 0x405   :  { %v1415_v14 = vpop.f32.mrf.mxu1 }
 0x406   :  { %v546_v16 = vsel %vm320_vm3, %v544_v13, -inf }
 0x407   :  { %547 = vmax.xlane.f32.xlu0 %v546_v16  ;;  %v489_v17 = vpop.f32.mrf.mxu1 }
 0x409   :  { %v1416_v18 = vpop.f32.mrf.mxu1 }
 0x40b   :  { %v538_v21 = vpop.f32.mrf.mxu1 }
 0x40c   :  { %v545_v22 = vmul.f32 0.17677669, %v538_v21 }
 0x40d   :  { %v1421_v23 = vpop.f32.mrf.mxu1 }
 0x40e   :  { %v549_v24 = vsel %vm320_vm3, %v545_v22, -inf }
 0x40f   :  { %550 = vmax.xlane.f32.xlu1 %v549_v24  ;;  %v541_v26 = vpop.f32.mrf.mxu1 }
 0x411   :  { %v1422_v28 = vpop.f32.mrf.mxu1 }
 0x420   :  { %620 = vrot.lane.b32.xlu1 %v1774_v54, %s1664_s0 }
 0x424   :  { %681 = vrot.lane.b32.xlu1 %v1735_v15, %s1665_s2 }
 0x428   :  { %731 = vrot.lane.b32.xlu1 %v1740_v19, %s1665_s2 }
 0x42c   :  { %729 = vrot.lane.b32.xlu1 %v1753_v27, %s1665_s2 }
 0x490   :  { %v548_v29 = vpop.xlane.xlu0 %547 }
 0x491   :  { %v552_v30 = vsub.f32 %v544_v13, %v548_v29 }
 0x493   :  { %v554_v31 = vmul.f32 1.442695, %v552_v30 }
 0x495   :  { %1525 = vpow2.f32 %v554_v31 }
 0x498   :  { %v551_v32 = vpop.xlane.xlu1 %550 }
 0x499   :  { %v553_v33 = vsub.f32 %v545_v22, %v551_v32 }
 0x49b   :  { %v556_v34 = vmul.f32 1.442695, %v553_v33 }
 0x49c   :  { %v621_v35 = vpop.permute.xlu1 %620 }
 0x49d   :  { %1527 = vpow2.f32 %v556_v34  ;;  %v626_v50 = vsel %vm348_vm2, %v621_v35, 0 }
 0x4a0   :  { %v682_v36 = vpop.permute.xlu1 %681 }
 0x4a1   :  { %v687_v37 = vsel %vm225_vm1, %v682_v36, 0 }
 0x4a2   :  { %v1526_v38 = vpop.eup %1525  ;;  %1436 = vmatpush3.bf16.xpose.msra.mxu0 %v687_v37 }
 0x4a3   :  { %v558_v39 = vsel %vm320_vm3, %v1526_v38, 0.0  ;;  %1447 = vmatprep.subr.bf16.mxu0 %v1662_v0 }
 0x4a4   :  { %559 = vadd.xlane.f32.xlu0 %v558_v39  ;;  %v732_v53 = vpop.permute.xlu1 %731 }
 0x4a5   :  { %v737_v57 = vsel %vm225_vm1, %v732_v53, 0 }
 0x4a8   :  { %v730_v58 = vpop.permute.xlu1 %729 }
 0x4aa   :  { %v1528_v40 = vpop.eup %1527 }
 0x4ab   :  { %v561_v41 = vsel %vm320_vm3, %v1528_v40, 0.0 }
 0x4ac   :  { %562 = vadd.xlane.f32.xlu0 %v561_v41 }
 0x4c2   :  { %571 = vrot.lane.b32.xlu0 %v1750_v25, %s1664_s0 }
 0x4c6   :  { %679 = vrot.lane.b32.xlu0 %v1742_v20, %s1665_s2 }
 0x52d   :  { %v560_v42 = vpop.xlane.xlu0 %559 }
 0x52e   :  { %1529 = vrcp.f32 %v560_v42 }
 0x535   :  { %v563_v43 = vpop.xlane.xlu0 %562 }
 0x536   :  { %1531 = vrcp.f32 %v563_v43 }
 0x539   :  { %v572_v44 = vpop.permute.xlu0 %571 }
 0x53a   :  { %v577_v45 = vsel %vm348_vm2, %v572_v44, 0 }
 0x53b   :  { %v1530_v46 = vpop.eup %1529  ;;  %1424 = vmatpush3.bf16.msra.mxu1 %v577_v45 }
 0x53c   :  { %1429 = vmatprep.subr.bf16.mxu1 %v1662_v0  ;;  %v1825_v47 = vmul.f32 %v1530_v46, %v1526_v38 }
 0x53d   :  { %v680_v48 = vpop.permute.xlu0 %679 }
 0x53e   :  { %1438 = vmatmul.mubr.msk.bf16.vlgmr.msra.gmra.mxu0 %vm225_vm1, %v680_v48  ;;  %v568_v49 = vpack.c.bf16 %v1825_v47, %v1825_v47 }
 0x53f   :  { %1449 = vmatprep.mubr.msk.bf16.mxu0 %vm1663_vm0, %v1662_v0 }
 0x540   :  { %1426 = vmatmul.mubr.msk.bf16.vlgmr.msra.gmra.mxu1 %vm320_vm3, %v568_v49 }
 0x541   :  { %1430 = vmatpush3.bf16.msra.mxu1 %v626_v50  ;;  %1431 = vmatprep.mubr.msk.bf16.mxu1 %vm1663_vm0, %v1662_v0 }
 0x542   :  { %1441 = vmatprep.subr.bf16.mxu1 %v1662_v0 }
 0x543   :  { %v1532_v51 = vpop.eup %1531 }
 0x544   :  { %v1837_v52 = vmul.f32 %v1532_v51, %v1528_v40 }
 0x546   :  { %v569_v56 = vpack.c.bf16 %v1837_v52, %v1837_v52 }
 0x548   :  { %1432 = vmatmul.mubr.msk.bf16.vlgmr.msra.gmra.mxu1 %vm320_vm3, %v569_v56 }
 0x549   :  { %1442 = vmatpush3.bf16.xpose.msra.mxu1 %v737_v57  ;;  %1443 = vmatprep.mubr.msk.bf16.mxu1 %vm1663_vm0, %v1662_v0 }
 0x54a   :  { %1453 = vmatprep.subr.bf16.mxu1 %v1662_v0 }
 0x550   :  { %1444 = vmatmul.mubr.msk.bf16.vlgmr.msra.gmra.mxu1 %vm225_vm1, %v730_v58 }
 0x551   :  { %1455 = vmatprep.mubr.msk.bf16.mxu1 %vm1663_vm0, %v1662_v0 }
 0x5fe   :  { %v723_v60 = vpop.f32.mrf.mxu0 }
 0x5ff   :  { %v779_v61 = vmul.f32 0.17677669, %v723_v60 }
 0x600   :  { %v1849_v62 = vpop.f32.mrf.mxu1  ;;  %v1439_v63 = vpop.f32.mrf.mxu0 }
 0x601   :  { %v781_v1 = vsel %vm320_vm3, %v779_v61, -inf }
 0x602   :  { %782 = vmax.xlane.f32.xlu0 %v781_v1  ;;  %v1427_v2 = vpop.f32.mrf.mxu1  ;;  %v726_v3 = vpop.f32.mrf.mxu0 }
 0x604   :  { %v616_v4 = vpop.f32.mrf.mxu1  ;;  %v1440_v5 = vpop.f32.mrf.mxu0 }
 0x606   :  { %v1428_v6 = vpop.f32.mrf.mxu1 }
 0x608   :  { %v1852_v7 = vpop.f32.mrf.mxu1 }
 0x60a   :  { %v1433_v8 = vpop.f32.mrf.mxu1 }
 0x60c   :  { %v665_v9 = vpop.f32.mrf.mxu1 }
 0x60e   :  { %v1434_v10 = vpop.f32.mrf.mxu1 }
 0x610   :  { %v773_v11 = vpop.f32.mrf.mxu1 }
 0x611   :  { %v780_v12 = vmul.f32 0.17677669, %v773_v11 }
 0x612   :  { %v1445_v13 = vpop.f32.mrf.mxu1 }
 0x613   :  { %v784_v14 = vsel %vm320_vm3, %v780_v12, -inf }
 0x614   :  { %785 = vmax.xlane.f32.xlu1 %v784_v14  ;;  %v776_v16 = vpop.f32.mrf.mxu1 }
 0x616   :  { %v1446_v17 = vpop.f32.mrf.mxu1 }
 0x625   :  { %853 = vrot.lane.b32.xlu1 %v1774_v54, %s1665_s2 }
 0x629   :  { %914 = vrot.lane.b32.xlu1 %v1735_v15, %s1666_s5 }
 0x62d   :  { %964 = vrot.lane.b32.xlu1 %v1740_v19, %s1666_s5 }
 0x631   :  { %962 = vrot.lane.b32.xlu1 %v1753_v27, %s1666_s5 }
 0x68b   :  { %v783_v18 = vpop.xlane.xlu0 %782 }
 0x68c   :  { %v787_v21 = vsub.f32 %v779_v61, %v783_v18 }
 0x68e   :  { %v789_v22 = vmul.f32 1.442695, %v787_v21 }
 0x690   :  { %1533 = vpow2.f32 %v789_v22 }
 0x69d   :  { %v1534_v23 = vpop.eup %1533  ;;  %v786_v24 = vpop.xlane.xlu1 %785 }
 0x69e   :  { %v788_v26 = vsub.f32 %v780_v12, %v786_v24  ;;  %v793_v28 = vsel %vm320_vm3, %v1534_v23, 0.0 }
 0x69f   :  { %794 = vadd.xlane.f32.xlu0 %v793_v28 }
 0x6a0   :  { %v791_v29 = vmul.f32 1.442695, %v788_v26 }
 0x6a1   :  { %v854_v30 = vpop.permute.xlu1 %853 }
 0x6a2   :  { %1535 = vpow2.f32 %v791_v29  ;;  %v859_v15 = vsel %vm348_vm2, %v854_v30, 0 }
 0x6a3   :  { %1454 = vmatpush3.bf16.msra.mxu1 %v859_v15 }
 0x6a4   :  { %1465 = vmatprep.subr.bf16.mxu1 %v1662_v0 }
 0x6a5   :  { %v915_v37 = vpop.permute.xlu1 %914 }
 0x6a6   :  { %v920_v39 = vsel %vm225_vm1, %v915_v37, 0 }
 0x6a9   :  { %v965_v41 = vpop.permute.xlu1 %964 }
 0x6aa   :  { %v970_v44 = vsel %vm225_vm1, %v965_v41, 0  ;;  %v1192_v41 = vld [vmem:[#allocation8 + $0x50] sm:$0xff] }
 0x6ad   :  { %v963_v45 = vpop.permute.xlu1 %962 }
 0x6af   :  { %v1536_v19 = vpop.eup %1535 }
 0x6b0   :  { %v796_v27 = vsel %vm320_vm3, %v1536_v19, 0.0 }
 0x6b1   :  { %797 = vadd.xlane.f32.xlu0 %v796_v27 }
 0x6c7   :  { %805 = vrot.lane.b32.xlu0 %v1750_v25, %s1665_s2 }
 0x6cb   :  { %912 = vrot.lane.b32.xlu0 %v1742_v20, %s1666_s5 }
 0x728   :  { %v795_v31 = vpop.xlane.xlu0 %794 }
 0x729   :  { %1537 = vrcp.f32 %v795_v31 }
 0x736   :  { %v1538_v32 = vpop.eup %1537 }
 0x737   :  { %v1871_v34 = vmul.f32 %v1538_v32, %v1534_v23 }
 0x739   :  { %v803_v38 = vpack.c.bf16 %v1871_v34, %v1871_v34 }
 0x73a   :  { %v798_v33 = vpop.xlane.xlu0 %797 }
 0x73b   :  { %1539 = vrcp.f32 %v798_v33 }
 0x73e   :  { %v806_v35 = vpop.permute.xlu0 %805 }
 0x73f   :  { %v811_v36 = vsel %vm348_vm2, %v806_v35, 0  ;;  %v1196_v35 = vld [vmem:[#allocation8 + $0x70] sm:$0xff] }
 0x740   :  { %1448 = vmatpush3.bf16.msra.mxu0 %v811_v36  ;;  %v1197_v36 = vld [vmem:[#allocation8 + $0x78] sm:$0xff] }
 0x741   :  { %1459 = vmatprep.subr.bf16.mxu0 %v1662_v0  ;;  %v1205_v37 = vpack.c.bf16 %v1197_v36, %v1196_v35 }
 0x742   :  { %v913_v42 = vpop.permute.xlu0 %912 }
 0x743   :  { %1450 = vmatmul.mubr.msk.bf16.vlgmr.msra.gmra.mxu0 %vm320_vm3, %v803_v38  ;;  %v1194_v38 = vld [vmem:[#allocation8 + $0x60] sm:$0xff] }
 0x744   :  { %1460 = vmatpush3.bf16.xpose.msra.mxu0 %v920_v39  ;;  %1461 = vmatprep.mubr.msk.bf16.mxu0 %vm1663_vm0, %v1662_v0  ;;  %v1195_v39 = vld [vmem:[#allocation8 + $0x68] sm:$0xff] }
 0x745   :  { %1471 = vmatprep.subr.bf16.mxu0 %v1662_v0 }
 0x748   :  { %v1540_v20 = vpop.eup %1539 }
 0x749   :  { %v1882_v40 = vmul.f32 %v1540_v20, %v1536_v19  ;;  %v1204_v20 = vpack.c.bf16 %v1195_v39, %v1194_v38 }
 0x74b   :  { %1462 = vmatmul.mubr.msk.bf16.vlgmr.msra.gmra.mxu0 %vm225_vm1, %v913_v42  ;;  %v804_v43 = vpack.c.bf16 %v1882_v40, %v1882_v40  ;;  %v1193_v42 = vld [vmem:[#allocation8 + $0x58] sm:$0xff] }
 0x74c   :  { %1473 = vmatprep.mubr.msk.bf16.mxu0 %vm1663_vm0, %v1662_v0 }
 0x74d   :  { %1456 = vmatmul.mubr.msk.bf16.vlgmr.msra.gmra.mxu1 %vm320_vm3, %v804_v43  ;;  %v1203_v43 = vpack.c.bf16 %v1193_v42, %v1192_v41 }
 0x74e   :  { %1466 = vmatpush3.bf16.xpose.msra.mxu1 %v970_v44  ;;  %1467 = vmatprep.mubr.msk.bf16.mxu1 %vm1663_vm0, %v1662_v0  ;;  %v1190_v44 = vld [vmem:[#allocation8 + $0x40] sm:$0xff] }
 0x74f   :  { %1477 = vmatprep.subr.bf16.mxu1 %v1662_v0 }
 0x755   :  { %1468 = vmatmul.mubr.msk.bf16.vlgmr.msra.gmra.mxu1 %vm225_vm1, %v963_v45  ;;  %v1191_v45 = vld [vmem:[#allocation8 + $0x48] sm:$0xff] }
 0x756   :  { %1479 = vmatprep.mubr.msk.bf16.mxu1 %vm1663_vm0, %v1662_v0 }
 0x803   :  { %v847_v46 = vpop.f32.mrf.mxu0 }
 0x805   :  { %v1451_v48 = vpop.f32.mrf.mxu0 }
 0x806   :  { %v1188_v48 = vld [vmem:[#allocation8 + $0x30] sm:$0xff] }
 0x807   :  { %v850_v49 = vpop.f32.mrf.mxu0 }
 0x808   :  { %v1189_v49 = vld [vmem:[#allocation8 + $0x38] sm:$0xff] }
 0x809   :  { %v1452_v50 = vpop.f32.mrf.mxu0 }
 0x80a   :  { %v1201_v50 = vpack.c.bf16 %v1189_v49, %v1188_v48 }
 0x80b   :  { %v956_v51 = vpop.f32.mrf.mxu0 }
 0x80c   :  { %v1012_v53 = vmul.f32 0.17677669, %v956_v51  ;;  %v1186_v51 = vld [vmem:[#allocation8 + $0x20] sm:$0xff] }
 0x80d   :  { %v895_v56 = vpop.f32.mrf.mxu1  ;;  %v1463_v57 = vpop.f32.mrf.mxu0 }
 0x80e   :  { %v1014_v58 = vsel %vm320_vm3, %v1012_v53, -inf  ;;  %v1184_v57 = vld [vmem:[#allocation8 + $0x10] sm:$0xff] }
 0x80f   :  { %1015 = vmax.xlane.f32.xlu0 %v1014_v58  ;;  %v1457_v60 = vpop.f32.mrf.mxu1  ;;  %v959_v61 = vpop.f32.mrf.mxu0  ;;  %v1185_v58 = vld [vmem:[#allocation8 + $0x18] sm:$0xff] }
 0x810   :  { %v1199_v60 = vpack.c.bf16 %v1185_v58, %v1184_v57  ;;  %v1182_v61 = vld [vmem:[#allocation8] sm:$0xff] }
 0x811   :  { %v898_v63 = vpop.f32.mrf.mxu1  ;;  %v1464_v1 = vpop.f32.mrf.mxu0 }
 0x812   :  { %v1183_v63 = vld [vmem:[#allocation8 + $0x8] sm:$0xff] }
 0x813   :  { %v1458_v2 = vpop.f32.mrf.mxu1 }
 0x814   :  { %v1198_v2 = vpack.c.bf16 %v1183_v63, %v1182_v61 }
 0x815   :  { %v1006_v3 = vpop.f32.mrf.mxu1 }
 0x816   :  { %v1013_v4 = vmul.f32 0.17677669, %v1006_v3 }
 0x817   :  { %v1469_v5 = vpop.f32.mrf.mxu1 }
 0x818   :  { %v1017_v6 = vsel %vm320_vm3, %v1013_v4, -inf }
 0x819   :  { %1018 = vmax.xlane.f32.xlu1 %v1017_v6  ;;  %v1009_v8 = vpop.f32.mrf.mxu1 }
 0x81b   :  { %v1470_v9 = vpop.f32.mrf.mxu1 }
 0x82a   :  { %1086 = vrot.lane.b32.xlu1 %v1774_v54, %s1666_s5 }
 0x82e   :  { %670 = vrot.lane.b32.xlu1 %v1849_v62, %s1666_s5 }
 0x832   :  { %672 = vrot.lane.b32.xlu1 %v1852_v7, %s1666_s5 }
 0x836   :  { %905 = vrot.lane.b32.xlu1 %v895_v56, %s1665_s2 }
 0x898   :  { %v1016_v10 = vpop.xlane.xlu0 %1015 }
 0x899   :  { %v1020_v11 = vsub.f32 %v1012_v53, %v1016_v10  ;;  %v1187_v53 = vld [vmem:[#allocation8 + $0x28] sm:$0xff] }
 0x89a   :  { %v1200_v56 = vpack.c.bf16 %v1187_v53, %v1186_v51 }
 0x89b   :  { %v1022_v12 = vmul.f32 1.442695, %v1020_v11 }
 0x89d   :  { %1541 = vpow2.f32 %v1022_v12 }
 0x8a2   :  { %v1019_v13 = vpop.xlane.xlu1 %1018 }
 0x8a3   :  { %v1021_v14 = vsub.f32 %v1013_v4, %v1019_v13 }
 0x8a5   :  { %v1024_v16 = vmul.f32 1.442695, %v1021_v14 }
 0x8a6   :  { %v1087_v17 = vpop.permute.xlu1 %1086 }
 0x8a7   :  { %1543 = vpow2.f32 %v1024_v16  ;;  %v1092_v18 = vsel %vm348_vm2, %v1087_v17, 0 }
 0x8a8   :  { %1478 = vmatpush3.bf16.msra.mxu1 %v1092_v18 }
 0x8aa   :  { %v1542_v54 = vpop.eup %1541  ;;  %v671_v62 = vpop.permute.xlu1 %670 }
 0x8ab   :  { %677 = vst.msk [vmem:[#allocation2] sm:$0xff] %vm676_vm4, %v671_v62  ;;  %v1026_v7 = vsel %vm320_vm3, %v1542_v54, 0.0 }
 0x8ac   :  { %1027 = vadd.xlane.f32.xlu0 %v1026_v7 }
 0x8ae   :  { %v673_v21 = vpop.permute.xlu1 %672 }
 0x8af   :  { %678 = vst.msk [vmem:[#allocation2 + $0x8] sm:$0xff] %vm676_vm4, %v673_v21 }
 0x8b2   :  { %v906_v22 = vpop.permute.xlu1 %905 }
 0x8b3   :  { %911 = vst.msk [vmem:[#allocation2 + $0x8] sm:$0xff] %vm909_vm5, %v906_v22 }
 0x8b4   :  { %v1544_v23 = vpop.eup %1543 }
 0x8b5   :  { %v1029_v24 = vsel %vm320_vm3, %v1544_v23, 0.0 }
 0x8b6   :  { %1030 = vadd.xlane.f32.xlu0 %v1029_v24 }
 0x8cc   :  { %1038 = vrot.lane.b32.xlu0 %v1750_v25, %s1666_s5 }
 0x8d0   :  { %903 = vrot.lane.b32.xlu0 %v847_v46, %s1665_s2  ;;  %v1202_v46 = vpack.c.bf16 %v1191_v45, %v1190_v44 }
 0x935   :  { %v1028_v26 = vpop.xlane.xlu0 %1027 }
 0x936   :  { %1545 = vrcp.f32 %v1028_v26 }
 0x93f   :  { %v1031_v28 = vpop.xlane.xlu0 %1030 }
 0x940   :  { %1547 = vrcp.f32 %v1031_v28 }
 0x943   :  { %v1546_v29 = vpop.eup %1545  ;;  %v1039_v30 = vpop.permute.xlu0 %1038 }
 0x944   :  { %v1044_v15 = vsel %vm348_vm2, %v1039_v30, 0  ;;  %v1033_v19 = vmul.f32 %v1546_v29, %v1542_v54 }
 0x945   :  { %1472 = vmatpush3.bf16.msra.mxu0 %v1044_v15 }
 0x946   :  { %v1036_v27 = vpack.c.bf16 %v1033_v19, %v1033_v19  ;;  %1483 = vmatprep.subr.bf16.mxu0 %v1662_v0 }
 0x947   :  { %v904_v31 = vpop.permute.xlu0 %903 }
 0x948   :  { %910 = vst.msk [vmem:[#allocation2] sm:$0xff] %vm909_vm5, %v904_v31  ;;  %1474 = vmatmul.mubr.msk.bf16.vlgmr.msra.gmra.mxu0 %vm320_vm3, %v1036_v27 }
 0x949   :  { %1499 = vmatprep.mubr.msk.bf16.mxu0 %vm1663_vm0, %v1662_v0  ;;  %1484 = vmatpush3.bf16.xpose.msra.mxu0 %v1205_v37 }
 0x94a   :  { %1485 = vmatprep.subr.bf16.mxu0 %v1662_v0 }
 0x94d   :  { %v1548_v25 = vpop.eup %1547 }
 0x94e   :  { %v1035_v32 = vmul.f32 %v1548_v25, %v1544_v23 }
 0x950   :  { %v1037_v33 = vpack.c.bf16 %v1035_v32, %v1035_v32 }
 0x951   :  { %1486 = vmatpush3.bf16.xpose.msra.mxu0 %v1204_v20 }
 0x952   :  { %1480 = vmatmul.mubr.msk.bf16.vlgmr.msra.gmra.mxu1 %vm320_vm3, %v1037_v33  ;;  %1487 = vmatprep.subr.bf16.mxu0 %v1662_v0 }
 0x959   :  { %1488 = vmatpush3.bf16.xpose.msra.mxu0 %v1203_v43 }
 0x95a   :  { %1489 = vmatprep.subr.bf16.mxu0 %v1662_v0 }
 0x961   :  { %1490 = vmatpush3.bf16.xpose.msra.mxu0 %v1202_v46 }
 0x962   :  { %1491 = vmatprep.subr.bf16.mxu0 %v1662_v0 }
 0x969   :  { %1492 = vmatpush3.bf16.xpose.msra.mxu0 %v1201_v50 }
 0x96a   :  { %1493 = vmatprep.subr.bf16.mxu0 %v1662_v0 }
 0x971   :  { %1494 = vmatpush3.bf16.xpose.msra.mxu0 %v1200_v56 }
 0x972   :  { %1495 = vmatprep.subr.bf16.mxu0 %v1662_v0 }
 0x979   :  { %1496 = vmatpush3.bf16.xpose.msra.mxu0 %v1199_v60 }
 0x97a   :  { %1497 = vmatprep.subr.bf16.mxu0 %v1662_v0 }
 0x981   :  { %1498 = vmatpush3.bf16.xpose.msra.mxu0 %v1198_v2 }
 0xa08   :  { %v1080_v1 = vpop.f32.mrf.mxu0 }
 0xa09   :  { %1136 = vrot.lane.b32.xlu0 %v1080_v1, %s1664_s0 }
 0xa0a   :  { %v1475_v3 = vpop.f32.mrf.mxu0 }
 0xa0c   :  { %v1083_v4 = vpop.f32.mrf.mxu0 }
 0xa0d   :  { %1147 = vrot.lane.b32.xlu0 %v1825_v47, %s1660_s21 }
 0xa0e   :  { %v1476_v5 = vpop.f32.mrf.mxu0 }
 0xa11   :  { %1155 = vrot.lane.b32.xlu0 %v1871_v34, %s1667_s6 }
 0xa12   :  { %v1128_v6 = vpop.f32.mrf.mxu1 }
 0xa13   :  { %1138 = vrot.lane.b32.xlu1 %v1128_v6, %s1664_s0 }
 0xa14   :  { %v1481_v0 = vpop.f32.mrf.mxu1 }
 0xa15   :  { %1163 = vrot.lane.b32.xlu0 %v1033_v19, %s1668_s7 }
 0xa16   :  { %v1131_v8 = vpop.f32.mrf.mxu1 }
 0xa17   :  { %1149 = vrot.lane.b32.xlu1 %v1837_v52, %s1660_s21 }
 0xa18   :  { %v1482_v9 = vpop.f32.mrf.mxu1 }
 0xa1b   :  { %1157 = vrot.lane.b32.xlu1 %v1882_v40, %s1667_s6 }
 0xa1f   :  { %1165 = vrot.lane.b32.xlu1 %v1035_v32, %s1668_s7 }
 0xa7b   :  { %v1137_v47 = vpop.permute.xlu0 %1136 }
 0xa7c   :  { %1143 = vst.msk [vmem:[#allocation2] sm:$0xff] %vm1142_vm6, %v1137_v47 }
 0xa7f   :  { %v1148_v10 = vpop.permute.xlu0 %1147 }
 0xa80   :  { %v1169_v12 = vsel %vm320_vm3, %v1776_v55, %v1148_v10 }
 0xa83   :  { %v1156_v11 = vpop.permute.xlu0 %1155  ;;  %v1179_v17 = vld [vmem:[#allocation2] sm:$0xff] }
 0xa84   :  { %v1172_v13 = vsel %vm1171_vm7, %v1169_v12, %v1156_v11 }
 0xa85   :  { %v1139_v34 = vpop.permute.xlu1 %1138 }
 0xa86   :  { %1144 = vst.msk [vmem:[#allocation2 + $0x8] sm:$0xff] %vm1142_vm6, %v1139_v34 }
 0xa87   :  { %v1164_v14 = vpop.permute.xlu0 %1163 }
 0xa88   :  { %v1175_v52 = vsel %vm1174_vm8, %v1172_v13, %v1164_v14 }
 0xa89   :  { %1177 = vst.msk [vmem:[#allocation10] sm:$0xff] %vm225_vm1, %v1175_v52  ;;  %v1150_v40 = vpop.permute.xlu1 %1149 }
 0xa8a   :  { %v1170_v62 = vsel %vm320_vm3, %v1786_v59, %v1150_v40 }
 0xa8d   :  { %v1158_v16 = vpop.permute.xlu1 %1157  ;;  %v1180_v18 = vld [vmem:[#allocation2 + $0x8] sm:$0xff] }
 0xa8e   :  { %v1181_v54 = vpack.c.bf16 %v1180_v18, %v1179_v17  ;;  %v1173_v7 = vsel %vm1171_vm7, %v1170_v62, %v1158_v16 }
 0xa90   :  { %1500 = vmatmul.mubr.bf16.vlgmr.msra.gmra.mxu0 %v1181_v54 }
 0xa91   :  { %v1166_v55 = vpop.permute.xlu1 %1165 }
 0xa92   :  { %v1176_v21 = vsel %vm1174_vm8, %v1173_v7, %v1166_v55 }
 0xa93   :  { %1178 = vst.msk [vmem:[#allocation10 + $0x8] sm:$0xff] %vm225_vm1, %v1176_v21 }
 0xa94   :  { %1620 = shalt.err (!%p1617_p5)
}
 0xa95   :  { %1272 = dma.vmem_to_hbm [thread:$0]  %s1267_s9, 256, %s1961_s4, [#allocation11], %s1659_s20, %s1659_s20, %s1660_s21  }
 0xa96   :  { %s1670_s13 = smov [#allocation9]  }
 0xa97   :  { %s1254_s14 = sshll.u32 %s1670_s13, 4  ;;  %s1255_s14 = int_to_ptr.vmem [resolvable:$true] %s1254_s14 }
 0xa98   :  { %s1629_s15 = scalar_lea.vmem %s1255_s14, 256  ;;  %p1634_p7 = scmp.lt.s32.totalorder %s1255_s14, %s1255_s14 }
 0xa99   :  { %p1630_p6 = scmp.ne.s32.totalorder %s1255_s14, %s1629_s15  ;;  %p1635_p8 = scmp.lt.s32.totalorder %s1629_s15, %s1629_s15 }
 0xa9b   :  { %p1636_p9 = por %p1635_p8, %p1634_p7 }
 0xa9d   :  { %p1637_p10 = pnand %p1636_p9, %p1630_p6 }
 0xb50   :  { %v1240_v59 = vpop.f32.mrf.mxu0 }
 0xb51   :  { %1247 = vst [vmem:[#allocation9] sm:$0xff] %v1240_v59 }
 0xb52   :  { %v1501_v22 = vpop.f32.mrf.mxu0 }
 0xb54   :  { %v1243_v23 = vpop.f32.mrf.mxu0 }
 0xb55   :  { %1248 = vst [vmem:[#allocation9 + $0x8] sm:$0xff] %v1243_v23 }
 0xb56   :  { %v1502_v24 = vpop.f32.mrf.mxu0 }
 0xb57   :  { %1640 = shalt.err (!%p1637_p10)
}
 0xb58   :  { %1260 = dma.vmem_to_hbm [thread:$0]  %s1255_s14, 256, %s1960_s3, [#allocation5], %s1659_s20, %s1659_s20, %s1660_s21  }
 0xb59   :  { %1653 = dma.done.wait [#allocation5], 256  }
 0xb5a   :  { %1654 = vsyncadd [#allocation5], 4294967040 }
 0xb5b   :  { %1655 = dma.done.wait [#allocation11], 256  }
 0xb5c   :  { %1656 = vsyncadd [#allocation11], 4294967040 }
 0xb5d   :  { %1279 = vsyncpa [#allocation4], 1 }
 0xb5e   :  { %1280 = vsyncpa [#allocation7], 1 }
 0xb5f   :  { %1281 = vsyncpa [#allocation5], 1 }
 0xb60   :  { %1282 = vsyncpa [#allocation11], 1 }

</bundles_post_ra>
